<compile_context>
chip_gen: v7x
topology: tpu7x:2x2x1
jax: 0.10.0
libtpu: 0.0.40
codegen_flags: <defaults>
</compile_context>

<pallas_src>
import functools

import jax
import jax.numpy as jnp
from jax.experimental import pallas as pl
from jax.experimental.pallas import tpu as pltpu


def _tv_partial_kernel(x_ref, wmask_ref, hmask_ref, o_ref, *, W, n_planes,
                       tile_planes, ragged):
    # x_ref: (tile_planes, H*W) block of the (N, H*W) array, native dtype.
    x = x_ref[...].astype(jnp.float32)

    # Backward differences via XLU rolls (no misaligned (H-1)/(W-1) slices):
    #   dw[p, i] = x[p, i] - x[p, i-1]   valid w-diff where (i % W) != 0
    #   dh[p, i] = x[p, i] - x[p, i-W]   valid h-diff where i >= W
    # Wrap-around positions are zeroed by the 0/1 mask vectors below; rolls
    # never mix different planes (axis=1 only), so planes stay independent.
    dw = x - pltpu.roll(x, shift=1, axis=1)
    dh = x - pltpu.roll(x, shift=W, axis=1)

    # Fuse the boundary mask with the lane reduction as a mask mat-vec on the
    # otherwise idle MXU: (tn, HW) @ (HW, 1) -> per-plane partial sums.
    w_pp = jnp.dot(dw * dw, wmask_ref[...], preferred_element_type=jnp.float32)
    h_pp = jnp.dot(dh * dh, hmask_ref[...], preferred_element_type=jnp.float32)

    if ragged:
        # The last block reads past the end of the planes axis; drop those
        # planes' partial sums with a select (NOT a multiply-by-zero) so
        # NaN/Inf garbage from the out-of-bounds read cannot leak in.
        rem = n_planes - pl.program_id(0) * tile_planes
        plane_ids = jax.lax.broadcasted_iota(jnp.int32, h_pp.shape, 0)
        keep = plane_ids < rem
        h_pp = jnp.where(keep, h_pp, 0.0)
        w_pp = jnp.where(keep, w_pp, 0.0)

    o_ref[0, 0] = jnp.sum(h_pp)
    o_ref[0, 1] = jnp.sum(w_pp)


def tv_loss(x, tv_loss_weight=1.0, *, max_block_planes=None):
    """Pallas TPU implementation of TVLoss.forward(x) for NCHW input."""
    B, C, H, W = x.shape
    N = B * C
    HW = H * W
    x2 = x.reshape(N, HW)  # lane-dense, layout-only reshape, native dtype

    # --- generation-aware VMEM / block sizing -------------------------------
    try:
        vmem_cap = int(pltpu.get_tpu_info().vmem_capacity_bytes)
    except Exception:  # interpret mode / API unavailable
        vmem_cap = 128 * 1024 * 1024
    # v5e/v6e (128 MiB physical) -> 64 MiB limit; v7x (64 MiB) -> 48 MiB.
    vmem_limit = min((3 * vmem_cap) // 4, 64 * 1024 * 1024)

    itemsize = jnp.dtype(x.dtype).itemsize
    native_plane = HW * itemsize
    f32_plane = HW * 4
    # Per-plane VMEM cost: double-buffered native input block + ~5 f32-sized
    # in-kernel temporaries (upcast, two rolls, two squared diffs).
    per_plane = 2 * native_plane + 5 * f32_plane
    budget = (vmem_limit * 6) // 10
    tn = max(1, budget // per_plane)
    if max_block_planes is not None:
        tn = min(tn, max_block_planes)

    # Keep the sublane (second-minor) block dim aligned unless it spans the
    # whole planes axis.
    sublane = max(8, 32 // itemsize)  # f32: 8, bf16: 16, int8: 32
    if tn >= N:
        tn = N
    else:
        tn = max(sublane, (tn // sublane) * sublane)
    # Megacore: give the "parallel" grid axis >= 2 steps when possible
    # without breaking the alignment above.
    if N >= 2 * sublane and pl.cdiv(N, tn) < 2:
        tn = sublane * pl.cdiv(pl.cdiv(N, 2), sublane)
    grid_n = pl.cdiv(N, tn)
    ragged = (N % tn) != 0

    # Make sure the chosen block (plus masks and slack) fits under the limit.
    needed = per_plane * tn + 2 * f32_plane + (2 << 20)
    vmem_limit = int(max(vmem_limit, min(needed, vmem_cap)))
    # TODO(synk): if a single (H*W) plane plus its f32 temporaries exceeds
    # physical VMEM, split H into row-strips overlapping by one row.

    # 0/1 boundary masks (f32), the RHS of the in-kernel mask mat-vec:
    #   w-diffs are invalid at the start of each image row (i % W == 0),
    #   h-diffs are invalid in the first image row (i < W).
    col = jnp.arange(HW, dtype=jnp.int32)
    w_mask = ((col % W) != 0).astype(jnp.float32).reshape(HW, 1)
    h_mask = (col >= W).astype(jnp.float32).reshape(HW, 1)

    kernel = functools.partial(
        _tv_partial_kernel, W=W, n_planes=N, tile_planes=tn, ragged=ragged
    )

    cost = pl.CostEstimate(
        flops=8 * N * HW,
        transcendentals=0,
        bytes_accessed=N * HW * itemsize + 2 * HW * 4 + grid_n * 8,
    )

    partials = pl.pallas_call(
        kernel,
        out_shape=jax.ShapeDtypeStruct((grid_n, 2), jnp.float32),
        grid_spec=pltpu.PrefetchScalarGridSpec(
            num_scalar_prefetch=0,
            grid=(grid_n,),
            in_specs=[
                pl.BlockSpec((tn, HW), lambda i: (i, 0)),
                pl.BlockSpec((HW, 1), lambda i: (0, 0)),
                pl.BlockSpec((HW, 1), lambda i: (0, 0)),
            ],
            out_specs=pl.BlockSpec(
                (1, 2), lambda i: (i, 0), memory_space=pltpu.MemorySpace.SMEM
            ),
        ),
        compiler_params=pltpu.CompilerParams(
            dimension_semantics=("parallel",),
            vmem_limit_bytes=vmem_limit,
        ),
        cost_estimate=cost,
    )(x2, w_mask, h_mask)

    h_tv = jnp.sum(partials[:, 0])
    w_tv = jnp.sum(partials[:, 1])
    count_h = (H - 1) * W
    count_w = H * (W - 1)
    return tv_loss_weight * 2.0 * (h_tv / count_h + w_tv / count_w) / B


def _tv_ref(x, weight=1.0):
    B, C, H, W = x.shape
    xf = x.astype(jnp.float32)
    h_tv = jnp.sum((xf[:, :, 1:, :] - xf[:, :, :-1, :]) ** 2)
    w_tv = jnp.sum((xf[:, :, :, 1:] - xf[:, :, :, :-1]) ** 2)
    return weight * 2.0 * (h_tv / ((H - 1) * W) + w_tv / (H * (W - 1))) / B


if __name__ == "__main__":
    key = jax.random.PRNGKey(0)
    k1, k2, k3 = jax.random.split(key, 3)

    # 1) f32 NCHW input: single full block, grid of 1.
    x = jax.random.normal(k1, (2, 4, 16, 16), dtype=jnp.float32)
    out = jax.block_until_ready(tv_loss(x))
    ref = _tv_ref(x)
    assert jnp.allclose(out, ref, rtol=2e-4, atol=1e-5), (out, ref)

    # 2) Ragged grid path + non-default weight: N=12 planes, 8 planes/block,
    #    so the last block is partial and exercises the per-plane select mask.
    xr = jax.random.normal(k3, (2, 6, 16, 16), dtype=jnp.float32)
    out_r = jax.block_until_ready(tv_loss(xr, 0.5, max_block_planes=8))
    ref_r = _tv_ref(xr, 0.5)
    assert jnp.allclose(out_r, ref_r, rtol=2e-4, atol=1e-5), (out_r, ref_r)

    # 3) Native bf16 input (no wrapper cast; upcast happens in-kernel).
    xb = jax.random.normal(k2, (2, 4, 16, 16), dtype=jnp.float32).astype(
        jnp.bfloat16
    )
    out_b = jax.block_until_ready(tv_loss(xb))
    ref_b = _tv_ref(xb)
    assert jnp.allclose(out_b, ref_b, rtol=2e-3, atol=1e-3), (out_b, ref_b)

    print("KERNEL_OK")
</pallas_src>

<mosaic_0001>
module attributes {stable_mosaic.version = 11 : i64} {
  func.func @_tv_partial_kernel(%arg0: i32, %arg1: memref<8x256xf32, #tpu.memory_space<vmem>>, %arg2: memref<256x1xf32, #tpu.memory_space<vmem>>, %arg3: memref<256x1xf32, #tpu.memory_space<vmem>>, %arg4: memref<1x2xf32, #tpu.memory_space<smem>>) attributes {dimension_semantics = [#tpu.dimension_semantics<parallel>], iteration_bounds = array<i64: 1>, scalar_prefetch = 0 : i64, scratch_operands = 0 : i64, tpu.core_type = #tpu.core_type<tc>, window_params = [{transform_indices = @transform_0, window_bounds = array<i64: 8, 256>}, {pipeline_mode = #tpu.pipeline_mode<synchronous>, transform_indices = @transform_1, window_bounds = array<i64: 256, 1>}, {pipeline_mode = #tpu.pipeline_mode<synchronous>, transform_indices = @transform_2, window_bounds = array<i64: 256, 1>}, {transform_indices = @transform_3, window_bounds = array<i64: 1, 2>}]} {
    %c0 = arith.constant 0 : index
    %c0_0 = arith.constant 0 : index
    %0 = vector.load %arg1[%c0, %c0_0] : memref<8x256xf32, #tpu.memory_space<vmem>>, vector<8x256xf32>
    %c1_i32 = arith.constant 1 : i32
    %1 = tpu.dynamic_rotate %0 by %c1_i32 dim 1 : vector<8x256xf32>, i32 -> vector<8x256xf32>
    %2 = arith.subf %0, %1 : vector<8x256xf32>
    %c16_i32 = arith.constant 16 : i32
    %3 = tpu.dynamic_rotate %0 by %c16_i32 dim 1 : vector<8x256xf32>, i32 -> vector<8x256xf32>
    %4 = arith.subf %0, %3 : vector<8x256xf32>
    %5 = arith.mulf %2, %2 : vector<8x256xf32>
    %c0_1 = arith.constant 0 : index
    %c0_2 = arith.constant 0 : index
    %6 = vector.load %arg2[%c0_1, %c0_2] : memref<256x1xf32, #tpu.memory_space<vmem>>, vector<256x1xf32>
    %cst = arith.constant dense<0.000000e+00> : vector<8x1xf32>
    %7 = tpu.matmul %5, %6, %cst {dimension_numbers = #tpu.dot_dimension_numbers<[1], [0], [0], [1], [0, 0, 1, 1], [], []>} : vector<8x256xf32>, vector<256x1xf32>, vector<8x1xf32> -> vector<8x1xf32>
    %8 = arith.mulf %4, %4 : vector<8x256xf32>
    %c0_3 = arith.constant 0 : index
    %c0_4 = arith.constant 0 : index
    %9 = vector.load %arg3[%c0_3, %c0_4] : memref<256x1xf32, #tpu.memory_space<vmem>>, vector<256x1xf32>
    %cst_5 = arith.constant dense<0.000000e+00> : vector<8x1xf32>
    %10 = tpu.matmul %8, %9, %cst_5 {dimension_numbers = #tpu.dot_dimension_numbers<[1], [0], [0], [1], [0, 0, 1, 1], [], []>} : vector<8x256xf32>, vector<256x1xf32>, vector<8x1xf32> -> vector<8x1xf32>
    %11 = vector.shape_cast %10 : vector<8x1xf32> to vector<1x8x1xf32>
    %cst_6 = arith.constant dense<0.000000e+00> : vector<1xf32>
    %12 = vector.multi_reduction <add>, %11, %cst_6 [1, 2] : vector<1x8x1xf32> to vector<1xf32>
    %13 = vector.shape_cast %12 : vector<1xf32> to vector<1x1x1xf32>
    %14 = vector.extract %13[0, 0, 0] : f32 from vector<1x1x1xf32>
    %c0_7 = arith.constant 0 : index
    %c0_8 = arith.constant 0 : index
    %15 = memref.load %arg4[%c0_7, %c0_8] : memref<1x2xf32, #tpu.memory_space<smem>>
    memref.store %14, %arg4[%c0_7, %c0_8] : memref<1x2xf32, #tpu.memory_space<smem>>
    %16 = vector.shape_cast %7 : vector<8x1xf32> to vector<1x8x1xf32>
    %cst_9 = arith.constant dense<0.000000e+00> : vector<1xf32>
    %17 = vector.multi_reduction <add>, %16, %cst_9 [1, 2] : vector<1x8x1xf32> to vector<1xf32>
    %18 = vector.shape_cast %17 : vector<1xf32> to vector<1x1x1xf32>
    %19 = vector.extract %18[0, 0, 0] : f32 from vector<1x1x1xf32>
    %c0_10 = arith.constant 0 : index
    %c1 = arith.constant 1 : index
    %20 = memref.load %arg4[%c0_10, %c1] : memref<1x2xf32, #tpu.memory_space<smem>>
    memref.store %19, %arg4[%c0_10, %c1] : memref<1x2xf32, #tpu.memory_space<smem>>
    return
  }
  func.func @transform_0(%arg0: i32) -> (i32, i32) {
    %c0_i32 = arith.constant 0 : i32
    %c0_i32_0 = arith.constant 0 : i32
    return %arg0, %c0_i32 : i32, i32
  }
  func.func @transform_1(%arg0: i32) -> (i32, i32) {
    %c0_i32 = arith.constant 0 : i32
    %c0_i32_0 = arith.constant 0 : i32
    %c0_i32_1 = arith.constant 0 : i32
    return %c0_i32, %c0_i32_0 : i32, i32
  }
  func.func @transform_2(%arg0: i32) -> (i32, i32) {
    %c0_i32 = arith.constant 0 : i32
    %c0_i32_0 = arith.constant 0 : i32
    %c0_i32_1 = arith.constant 0 : i32
    return %c0_i32, %c0_i32_0 : i32, i32
  }
  func.func @transform_3(%arg0: i32) -> (i32, i32) {
    %c0_i32 = arith.constant 0 : i32
    %c0_i32_0 = arith.constant 0 : i32
    return %arg0, %c0_i32 : i32, i32
  }
}

</mosaic_0001>

<bundles_post_ra>
// kernel: tpu_custom_call.1
= control target key start
LH: loop header
LB: loop body
LE: loop exit
PB: predicated region body
PF: predicated region fallthrough
CT: control target
= control target key end

     0   :  { %8 = vsyncpa [#allocation3], 0  ;;  %s646_s0 = inlined_call_operand.hbm [shape: f32[8,256], index: 0, kind: input, shape index: {}]   ;;  %s647_s1 = inlined_call_operand.hbm [shape: f32[256,1], index: 1, kind: input, shape index: {}]   ;;  %s648_s2 = inlined_call_operand.hbm [shape: f32[256,1], index: 2, kind: input, shape index: {}]   ;;  %s649_s3 = inlined_call_operand.hbm [shape: f32[1,2], index: 3, kind: output, shape index: {}]  }
   0x1   :  { %9 = vsyncpa [#allocation6], 0 }
   0x2   :  { %10 = vsyncpa [#allocation4], 0  ;;  %s552_s12 = smov [#allocation5]   ;;  %s470_s16 = scalar_lea.hbm %s647_s1, 4096 }
   0x3   :  { %s26_s13 = sshll.u32 %s552_s12, 4  ;;  %p471_p0 = scmp.ne.s32.totalorder %s647_s1, %s470_s16  ;;  %s27_s13 = int_to_ptr.vmem [resolvable:$true] %s26_s13 }
   0x4   :  { %p474_p1 = scmp.lt.u32.totalorder %s470_s16, %s647_s1 }
   0x6   :  { %p476_p2 = pnand %p474_p1, %p471_p0 }
   0x8   :  { %479 = shalt.err (!%p476_p2)
}
   0x9   :  { %s480_s21 = scalar_lea.vmem %s27_s13, 4096  ;;  %p485_p4 = scmp.lt.s32.totalorder %s27_s13, %s27_s13 }
   0xa   :  { %p481_p3 = scmp.ne.s32.totalorder %s27_s13, %s480_s21  ;;  %p486_p5 = scmp.lt.s32.totalorder %s480_s21, %s480_s21 }
   0xc   :  { %p487_p6 = por %p486_p5, %p485_p4 }
   0xe   :  { %p488_p7 = pnand %p487_p6, %p481_p3 }
  0x10   :  { %491 = shalt.err (!%p488_p7)
}
  0x11   :  { %s553_s22 = smov 128   ;;  %s554_s23 = smov 8  }
  0x12   :  { %32 = dma.hbm_to_vmem [thread:$0]  %s647_s1, 4096, %s27_s13, [#allocation6], %s553_s22, %s553_s22, %s554_s23  }
  0x13   :  { %s555_s26 = smov [#allocation2]   ;;  %s556_s28 = smov [#allocation7]  }
  0x14   :  { %s17_s27 = sshll.u32 %s555_s26, 4  ;;  %s38_s29 = sshll.u32 %s556_s28, 4  ;;  %s18_s27 = int_to_ptr.vmem [resolvable:$true] %s17_s27  ;;  %s39_s29 = int_to_ptr.vmem [resolvable:$true] %s38_s29 }
  0x15   :  { %s492_s5 = scalar_lea.hbm %s646_s0, 256 }
  0x16   :  { %p493_p8 = scmp.ne.s32.totalorder %s646_s0, %s492_s5  ;;  %p496_p9 = scmp.lt.u32.totalorder %s492_s5, %s646_s0 }
  0x18   :  { %p498_p10 = pnand %p496_p9, %p493_p8 }
  0x1a   :  { %501 = shalt.err (!%p498_p10)
}
  0x1b   :  { %s502_s1 = scalar_lea.vmem %s18_s27, 256  ;;  %p507_p12 = scmp.lt.s32.totalorder %s18_s27, %s18_s27 }
  0x1c   :  { %p503_p11 = scmp.ne.s32.totalorder %s18_s27, %s502_s1  ;;  %p508_p13 = scmp.lt.s32.totalorder %s502_s1, %s502_s1 }
  0x1e   :  { %p509_p0 = por %p508_p13, %p507_p12 }
  0x20   :  { %p510_p1 = pnand %p509_p0, %p503_p11 }
  0x22   :  { %513 = shalt.err (!%p510_p1)
}
  0x23   :  { %20 = dma.hbm_to_vmem [thread:$0]  %s646_s0, 256, %s18_s27, [#allocation3]  }
  0x24   :  { %s514_s14 = scalar_lea.hbm %s648_s2, 4096 }
  0x25   :  { %p515_p2 = scmp.ne.s32.totalorder %s648_s2, %s514_s14  ;;  %p518_p3 = scmp.lt.u32.totalorder %s514_s14, %s648_s2 }
  0x27   :  { %p520_p4 = pnand %p518_p3, %p515_p2 }
  0x29   :  { %523 = shalt.err (!%p520_p4)
}
  0x2a   :  { %s524_s19 = scalar_lea.vmem %s39_s29, 4096  ;;  %p529_p6 = scmp.lt.s32.totalorder %s39_s29, %s39_s29 }
  0x2b   :  { %p525_p5 = scmp.ne.s32.totalorder %s39_s29, %s524_s19  ;;  %p530_p7 = scmp.lt.s32.totalorder %s524_s19, %s524_s19 }
  0x2d   :  { %p531_p8 = por %p530_p7, %p529_p6 }
  0x2f   :  { %p532_p9 = pnand %p531_p8, %p525_p5 }
  0x31   :  { %535 = shalt.err (!%p532_p9)
}
  0x32   :  { %44 = dma.hbm_to_vmem [thread:$0]  %s648_s2, 4096, %s39_s29, [#allocation6], %s553_s22, %s553_s22, %s554_s23  }
  0x33   :  { %546 = dma.done.wait [#allocation3], 256  }
  0x34   :  { %547 = vsyncadd [#allocation3], 4294967040 }
  0x35   :  { %548 = dma.done.wait [#allocation6], 8192  }
  0x36   :  { %549 = vsyncadd [#allocation6], 4294959104  ;;  %v622_v0 = vld [vmem:[#allocation2] sm:$0xff]  ;;  %v624_v1 = vld [vmem:[#allocation2 + $0x8] sm:$0xff]  ;;  %s557_s21 = smov 16   ;;  %s558_s24 = smov 1  }
  0x37   :  { %v94_v2 = vld [vmem:[#allocation5 + $0x80] sm:$0xff]  ;;  %67 = vrot.lane.b32.xlu1 %v622_v0, %s557_s21  ;;  %56 = vrot.lane.b32.xlu0 %v622_v0, %s558_s24  ;;  %v95_v3 = vld [vmem:[#allocation5 + $0x88] sm:$0xff]  ;;  %v96_v13 = vld [vmem:[#allocation5 + $0x90] sm:$0xff]  ;;  %vm284_vm2 = vcmask 7168   ;;  %s536_s26 = scalar_lea.hbm %s649_s3, 16 }
  0x38   :  { %v198_v4 = vld [vmem:[#allocation7 + $0x80] sm:$0xff]  ;;  %v199_v5 = vld [vmem:[#allocation7 + $0x88] sm:$0xff]  ;;  %v394_v6 = vpack.c.bf16 %v95_v3, %v94_v2  ;;  %v97_v14 = vld [vmem:[#allocation5 + $0x98] sm:$0xff]  ;;  %p537_p10 = scmp.ne.s32.totalorder %s649_s3, %s536_s26  ;;  %p540_p11 = scmp.lt.u32.totalorder %s536_s26, %s649_s3 }
  0x39   :  { %v426_v7 = vpack.c.bf16 %v199_v5, %v198_v4  ;;  %v78_v8 = vld [vmem:[#allocation5] sm:$0xff]  ;;  %v79_v9 = vld [vmem:[#allocation5 + $0x8] sm:$0xff]  ;;  %v398_v16 = vpack.c.bf16 %v97_v14, %v96_v13  ;;  %v200_v17 = vld [vmem:[#allocation7 + $0x90] sm:$0xff] }
  0x3a   :  { %v182_v10 = vld [vmem:[#allocation7] sm:$0xff]  ;;  %v396_v11 = vpack.c.bf16 %v79_v9, %v78_v8  ;;  %v183_v12 = vld [vmem:[#allocation7 + $0x8] sm:$0xff]  ;;  %395 = vmatprep.subr.bf16.mxu0 %v394_v6  ;;  %v201_v18 = vld [vmem:[#allocation7 + $0x98] sm:$0xff]  ;;  %p542_p12 = pnand %p540_p11, %p537_p10 }
  0x3b   :  { %427 = vmatprep.subr.bf16.mxu1 %v426_v7  ;;  %v428_v15 = vpack.c.bf16 %v183_v12, %v182_v10  ;;  %v80_v19 = vld [vmem:[#allocation5 + $0x10] sm:$0xff]  ;;  %69 = vrot.lane.b32.xlu1 %v624_v1, %s557_s21  ;;  %v430_v20 = vpack.c.bf16 %v201_v18, %v200_v17  ;;  %v81_v21 = vld [vmem:[#allocation5 + $0x18] sm:$0xff]  ;;  %v98_v26 = vld [vmem:[#allocation5 + $0xa0] sm:$0xff] }
  0x3c   :  { %58 = vrot.lane.b32.xlu0 %v624_v1, %s558_s24  ;;  %v184_v22 = vld [vmem:[#allocation7 + $0x10] sm:$0xff]  ;;  %v185_v23 = vld [vmem:[#allocation7 + $0x18] sm:$0xff]  ;;  %397 = vmatpush3.bf16.msra.mxu0 %v396_v11  ;;  %v400_v24 = vpack.c.bf16 %v81_v21, %v80_v19  ;;  %v99_v27 = vld [vmem:[#allocation5 + $0xa8] sm:$0xff] }
  0x3d   :  { %429 = vmatpush3.bf16.msra.mxu1 %v428_v15  ;;  %v432_v25 = vpack.c.bf16 %v185_v23, %v184_v22  ;;  %v202_v28 = vld [vmem:[#allocation7 + $0xa0] sm:$0xff]  ;;  %399 = vmatprep.subr.bf16.mxu0 %v398_v16  ;;  %v402_v29 = vpack.c.bf16 %v99_v27, %v98_v26  ;;  %v203_v30 = vld [vmem:[#allocation7 + $0xa8] sm:$0xff]  ;;  %v100_v36 = vld [vmem:[#allocation5 + $0xb0] sm:$0xff] }
  0x3e   :  { %431 = vmatprep.subr.bf16.mxu1 %v430_v20  ;;  %v82_v31 = vld [vmem:[#allocation5 + $0x20] sm:$0xff]  ;;  %v83_v32 = vld [vmem:[#allocation5 + $0x28] sm:$0xff]  ;;  %v434_v33 = vpack.c.bf16 %v203_v30, %v202_v28  ;;  %v101_v37 = vld [vmem:[#allocation5 + $0xb8] sm:$0xff] }
  0x3f   :  { %v186_v34 = vld [vmem:[#allocation7 + $0x20] sm:$0xff]  ;;  %v187_v35 = vld [vmem:[#allocation7 + $0x28] sm:$0xff]  ;;  %v204_v38 = vld [vmem:[#allocation7 + $0xb0] sm:$0xff]  ;;  %v404_v40 = vpack.c.bf16 %v83_v32, %v82_v31  ;;  %v406_v44 = vpack.c.bf16 %v101_v37, %v100_v36  ;;  %v60_v36 = vlaneseq }
  0x40   :  { %v205_v39 = vld [vmem:[#allocation7 + $0xb8] sm:$0xff]  ;;  %401 = vmatpush3.bf16.msra.mxu0 %v400_v24  ;;  %v436_v41 = vpack.c.bf16 %v187_v35, %v186_v34  ;;  %v84_v42 = vld [vmem:[#allocation5 + $0x30] sm:$0xff]  ;;  %v102_v48 = vld [vmem:[#allocation5 + $0xc0] sm:$0xff] }
  0x41   :  { %433 = vmatpush3.bf16.msra.mxu1 %v432_v25  ;;  %v85_v43 = vld [vmem:[#allocation5 + $0x38] sm:$0xff]  ;;  %403 = vmatprep.subr.bf16.mxu0 %v402_v29  ;;  %v438_v45 = vpack.c.bf16 %v205_v39, %v204_v38  ;;  %v188_v46 = vld [vmem:[#allocation7 + $0x30] sm:$0xff]  ;;  %v103_v49 = vld [vmem:[#allocation5 + $0xc8] sm:$0xff]  ;;  %v61_v37 = vand.u32 127, %v60_v36 }
  0x42   :  { %435 = vmatprep.subr.bf16.mxu1 %v434_v33  ;;  %v189_v47 = vld [vmem:[#allocation7 + $0x38] sm:$0xff]  ;;  %v206_v50 = vld [vmem:[#allocation7 + $0xc0] sm:$0xff]  ;;  %v207_v51 = vld [vmem:[#allocation7 + $0xc8] sm:$0xff]  ;;  %v408_v52 = vpack.c.bf16 %v85_v43, %v84_v42  ;;  %v410_v56 = vpack.c.bf16 %v103_v49, %v102_v48 }
  0x43   :  { %v440_v53 = vpack.c.bf16 %v189_v47, %v188_v46  ;;  %v86_v54 = vld [vmem:[#allocation5 + $0x40] sm:$0xff]  ;;  %v87_v55 = vld [vmem:[#allocation5 + $0x48] sm:$0xff]  ;;  %v442_v57 = vpack.c.bf16 %v207_v51, %v206_v50  ;;  %v104_v60 = vld [vmem:[#allocation5 + $0xd0] sm:$0xff]  ;;  %vm71_vm0 = vcmp.lt.s32.totalorder %v61_v37, 16  ;;  %vm62_vm1 = vcmp.lt.s32.totalorder %v61_v37, 1 }
  0x44   :  { %405 = vmatpush3.bf16.msra.mxu0 %v404_v40  ;;  %v190_v58 = vld [vmem:[#allocation7 + $0x40] sm:$0xff]  ;;  %v191_v59 = vld [vmem:[#allocation7 + $0x48] sm:$0xff]  ;;  %v105_v61 = vld [vmem:[#allocation5 + $0xd8] sm:$0xff]  ;;  %v412_v2 = vpack.c.bf16 %v87_v55, %v86_v54 }
  0x45   :  { %437 = vmatpush3.bf16.msra.mxu1 %v436_v41  ;;  %407 = vmatprep.subr.bf16.mxu0 %v406_v44  ;;  %v208_v62 = vld [vmem:[#allocation7 + $0xd0] sm:$0xff]  ;;  %v209_v63 = vld [vmem:[#allocation7 + $0xd8] sm:$0xff]  ;;  %v444_v3 = vpack.c.bf16 %v191_v59, %v190_v58  ;;  %v414_v6 = vpack.c.bf16 %v105_v61, %v104_v60  ;;  %v106_v10 = vld [vmem:[#allocation5 + $0xe0] sm:$0xff] }
  0x46   :  { %439 = vmatprep.subr.bf16.mxu1 %v438_v45  ;;  %v88_v4 = vld [vmem:[#allocation5 + $0x50] sm:$0xff]  ;;  %v89_v5 = vld [vmem:[#allocation5 + $0x58] sm:$0xff]  ;;  %v446_v7 = vpack.c.bf16 %v209_v63, %v208_v62  ;;  %v107_v11 = vld [vmem:[#allocation5 + $0xe8] sm:$0xff] }
  0x47   :  { %v192_v8 = vld [vmem:[#allocation7 + $0x50] sm:$0xff]  ;;  %v193_v9 = vld [vmem:[#allocation7 + $0x58] sm:$0xff]  ;;  %v210_v12 = vld [vmem:[#allocation7 + $0xe0] sm:$0xff]  ;;  %v416_v14 = vpack.c.bf16 %v89_v5, %v88_v4  ;;  %v418_v18 = vpack.c.bf16 %v107_v11, %v106_v10 }
  0x48   :  { %409 = vmatpush3.bf16.msra.mxu0 %v408_v52  ;;  %v211_v13 = vld [vmem:[#allocation7 + $0xe8] sm:$0xff]  ;;  %v448_v15 = vpack.c.bf16 %v193_v9, %v192_v8  ;;  %v90_v16 = vld [vmem:[#allocation5 + $0x60] sm:$0xff]  ;;  %v108_v22 = vld [vmem:[#allocation5 + $0xf0] sm:$0xff] }
  0x49   :  { %441 = vmatpush3.bf16.msra.mxu1 %v440_v53  ;;  %411 = vmatprep.subr.bf16.mxu0 %v410_v56  ;;  %v91_v17 = vld [vmem:[#allocation5 + $0x68] sm:$0xff]  ;;  %v450_v19 = vpack.c.bf16 %v211_v13, %v210_v12  ;;  %v194_v20 = vld [vmem:[#allocation7 + $0x60] sm:$0xff]  ;;  %v109_v23 = vld [vmem:[#allocation5 + $0xf8] sm:$0xff] }
  0x4a   :  { %443 = vmatprep.subr.bf16.mxu1 %v442_v57  ;;  %v195_v21 = vld [vmem:[#allocation7 + $0x68] sm:$0xff]  ;;  %v212_v24 = vld [vmem:[#allocation7 + $0xf0] sm:$0xff]  ;;  %v213_v25 = vld [vmem:[#allocation7 + $0xf8] sm:$0xff]  ;;  %v420_v26 = vpack.c.bf16 %v91_v17, %v90_v16  ;;  %v422_v29 = vpack.c.bf16 %v109_v23, %v108_v22 }
  0x4b   :  { %v452_v27 = vpack.c.bf16 %v195_v21, %v194_v20  ;;  %v92_v28 = vld [vmem:[#allocation5 + $0x70] sm:$0xff]  ;;  %v454_v30 = vpack.c.bf16 %v213_v25, %v212_v24  ;;  %v93_v31 = vld [vmem:[#allocation5 + $0x78] sm:$0xff] }
  0x4c   :  { %413 = vmatpush3.bf16.msra.mxu0 %v412_v2  ;;  %v196_v32 = vld [vmem:[#allocation7 + $0x70] sm:$0xff]  ;;  %v197_v33 = vld [vmem:[#allocation7 + $0x78] sm:$0xff]  ;;  %v424_v34 = vpack.c.bf16 %v93_v31, %v92_v28 }
  0x4d   :  { %445 = vmatpush3.bf16.msra.mxu1 %v444_v3  ;;  %415 = vmatprep.subr.bf16.mxu0 %v414_v6  ;;  %v456_v35 = vpack.c.bf16 %v197_v33, %v196_v32 }
  0x4e   :  { %447 = vmatprep.subr.bf16.mxu1 %v446_v7 }
  0x50   :  { %417 = vmatpush3.bf16.msra.mxu0 %v416_v14 }
  0x51   :  { %449 = vmatpush3.bf16.msra.mxu1 %v448_v15  ;;  %419 = vmatprep.subr.bf16.mxu0 %v418_v18 }
  0x52   :  { %451 = vmatprep.subr.bf16.mxu1 %v450_v19 }
  0x54   :  { %421 = vmatpush3.bf16.msra.mxu0 %v420_v26 }
  0x55   :  { %453 = vmatpush3.bf16.msra.mxu1 %v452_v27  ;;  %423 = vmatprep.subr.bf16.mxu0 %v422_v29 }
  0x56   :  { %455 = vmatprep.subr.bf16.mxu1 %v454_v30 }
  0x58   :  { %425 = vmatpush3.bf16.msra.mxu0 %v424_v34 }
  0x59   :  { %457 = vmatpush3.bf16.msra.mxu1 %v456_v35 }
  0xa9   :  { %v68_v38 = vpop.permute.xlu1 %67  ;;  %v57_v39 = vpop.permute.xlu0 %56 }
  0xad   :  { %v70_v40 = vpop.permute.xlu1 %69 }
  0xae   :  { %v59_v41 = vpop.permute.xlu0 %58  ;;  %v73_v42 = vsel %vm71_vm0, %v70_v40, %v68_v38  ;;  %v72_v45 = vsel %vm71_vm0, %v68_v38, %v70_v40 }
  0xaf   :  { %v64_v43 = vsel %vm62_vm1, %v59_v41, %v57_v39  ;;  %v63_v44 = vsel %vm62_vm1, %v57_v39, %v59_v41  ;;  %v74_v46 = vsub.f32 %v622_v0, %v73_v42  ;;  %v75_v49 = vsub.f32 %v624_v1, %v72_v45 }
  0xb0   :  { %v65_v47 = vsub.f32 %v622_v0, %v64_v43  ;;  %v66_v48 = vsub.f32 %v624_v1, %v63_v44 }
  0xb1   :  { %v180_v50 = vmul.f32 %v74_v46, %v74_v46  ;;  %v181_v53 = vmul.f32 %v75_v49, %v75_v49 }
  0xb2   :  { %v76_v51 = vmul.f32 %v65_v47, %v65_v47  ;;  %v77_v52 = vmul.f32 %v66_v48, %v66_v48 }
  0xb3   :  { %278 = vmatprep.mubr.f32.mxu1 %v181_v53 }
  0xb4   :  { %174 = vmatprep.mubr.f32.mxu0 %v77_v52  ;;  %279 = vmatmul.mubr.f32.vlgmr.msra.gmra.mrb[0].mxu1 %v180_v50 }
  0xb5   :  { %175 = vmatmul.mubr.f32.vlgmr.msra.gmra.mrb[0].mxu0 %v76_v51 }
 0x187   :  { %v391_v55 = vpop.f32.mrb[0].mxu1 }
 0x188   :  { %v356_v54 = vpop.f32.mrb[0].mxu0  ;;  %v392_v57 = vpop.f32.mrb[1].mxu1 }
 0x189   :  { %v357_v56 = vpop.f32.mrb[1].mxu0  ;;  %v393_v59 = vadd.f32 %v392_v57, %v391_v55 }
 0x18a   :  { %v358_v58 = vadd.f32 %v357_v56, %v356_v54 }
 0x18b   :  { %v285_v0 = vsel %vm284_vm2, %v393_v59, 0.0 }
 0x18c   :  { %v297_v60 = vsel %vm284_vm2, %v358_v58, 0.0  ;;  %286 = vadd.xlane.f32.xlu0 %v285_v0 }
 0x18d   :  { %298 = vadd.xlane.f32.xlu1 %v297_v60 }
 0x219   :  { %v287_v61 = vpop.xlane.xlu0 %286 }
 0x21a   :  { %v299_v1 = vpop.xlane.xlu1 %298  ;;  %v288_v63 = vrot.slane %v287_v61, 4 }
 0x21b   :  { %v300_v62 = vrot.slane %v299_v1, 4 }
 0x21c   :  { %v289_v3 = vadd.f32 %v288_v63, %v287_v61 }
 0x21d   :  { %v301_v2 = vadd.f32 %v300_v62, %v299_v1 }
 0x21e   :  { %v290_v5 = vrot.slane %v289_v3, 2 }
 0x21f   :  { %v302_v4 = vrot.slane %v301_v2, 2 }
 0x220   :  { %v291_v7 = vadd.f32 %v290_v5, %v289_v3 }
 0x221   :  { %v303_v6 = vadd.f32 %v302_v4, %v301_v2 }
 0x222   :  { %v292_v8 = vrot.slane %v291_v7, 1 }
 0x223   :  { %v304_v9 = vrot.slane %v303_v6, 1 }
 0x224   :  { %v293_v10 = vadd.f32 %v292_v8, %v291_v7 }
 0x225   :  { %v305_v11 = vadd.f32 %v304_v9, %v303_v6 }
 0x226   :  { %458 = vpush %v293_v10 }
 0x227   :  { %460 = vpush %v305_v11 }
 0x257   :  { %s459_s2 = spop %458 }
 0x258   :  { %296 = sst [smem:[#allocation8]] %s459_s2  ;;  %s461_s22 = spop %460 }
 0x259   :  { %308 = sst [smem:[#allocation8 + $0x1]] %s461_s22 }
 0x25a   :  { %545 = shalt.err (!%p542_p12)
}
 0x25b   :  { %s559_s4 = smov [#allocation8]  }
 0x25c   :  { %316 = dma.smem_to_hbm %s559_s4, 16, %s649_s3, [#allocation4]  }
 0x25d   :  { %550 = dma.done.wait [#allocation4], 16  }
 0x25e   :  { %551 = vsyncadd [#allocation4], 4294967280 }
 0x25f   :  { %320 = sfence }
 0x260   :  { %321 = vsyncpa [#allocation3], 1 }
 0x261   :  { %322 = vsyncpa [#allocation6], 1 }
 0x262   :  { %323 = vsyncpa [#allocation4], 1 }

</bundles_post_ra>
